<compile_context>
chip_gen: v7x
topology: tpu7x:2x2x1
jax: 0.10.0
libtpu: 0.0.40
codegen_flags: <defaults>
</compile_context>

<pallas_src>
import functools

import numpy as np
import jax
import jax.numpy as jnp
from jax.experimental import pallas as pl
from jax.experimental.pallas import tpu as pltpu

_EPS = 1e-12                   # matches torch F.normalize clamp_min eps
_MIN_SPLIT_ELEMS = 256 * 1024  # only split a single-block grid above this
_PACK_LANE_TARGET = 128        # packed width target for small-C trailing dim
                               # (kept at one vreg so the MXU segmented reduce
                               # stays hidden behind the HBM DMA on all gens)


def _round_up(a: int, b: int) -> int:
    return ((a + b - 1) // b) * b


def _sublane_multiple(dtype) -> int:
    size = jnp.dtype(dtype).itemsize
    if size == 2:
        return 16
    if size == 1:
        return 32
    return 8


def _vmem_limit_bytes() -> int:
    """Generation-aware scoped-VMEM limit: half of physical, capped at 64 MiB.

    -> 64 MiB on v5e/v6e (128 MiB physical), 32 MiB on v7x (64 MiB per TC).
    """
    try:
        cap = int(pltpu.get_tpu_info().vmem_capacity_bytes)
    except Exception:
        cap = 64 * 1024 * 1024
    return max(16 * 1024 * 1024, min(64 * 1024 * 1024, cap // 2))


def _max_block_elems(dtype, vmem_limit: int) -> int:
    """Max physical (padded) elements per block.

    Budget: double-buffered input + output blocks (4 * itemsize per element)
    plus ~2 f32-wide compute temporaries (8 bytes per element for the upcast /
    result), kept within 70% of the scoped VMEM limit.
    """
    itemsize = jnp.dtype(dtype).itemsize
    bytes_per_elem = 4 * itemsize + 8
    return max(8 * 128, int(vmem_limit * 0.70) // bytes_per_elem)


def _compiler_params(sem, vmem_limit):
    return pltpu.CompilerParams(dimension_semantics=sem,
                                vmem_limit_bytes=int(vmem_limit))


# --------------------------------------------------------------------------
# Kernels
# --------------------------------------------------------------------------

def _l2norm_mid_kernel(x_ref, o_ref):
    # x_ref: (tb, C, tp); normalize along axis=1 (full channel extent).
    x = x_ref[...].astype(jnp.float32)
    sumsq = jnp.sum(x * x, axis=1, keepdims=True)
    inv = jax.lax.rsqrt(jnp.maximum(sumsq, _EPS * _EPS))
    o_ref[...] = (x * inv).astype(o_ref.dtype)


def _l2norm_last_kernel(x_ref, o_ref):
    # x_ref: (tm, D); normalize along the last (lane) axis (full extent).
    x = x_ref[...].astype(jnp.float32)
    sumsq = jnp.sum(x * x, axis=-1, keepdims=True)
    inv = jax.lax.rsqrt(jnp.maximum(sumsq, _EPS * _EPS))
    o_ref[...] = (x * inv).astype(o_ref.dtype)


def _l2norm_packed_kernel(x_ref, o_ref, *, c):
    # x_ref: (tm, W) with W = k*c packing k independent length-c vectors per
    # lane row.  Segmented sum-of-squares via a block-diagonal 0/1 matmul on
    # the otherwise-idle MXU; the result is already broadcast back over each
    # segment, so the store stays fully lane-dense (no masked vst).
    x = x_ref[...].astype(jnp.float32)
    w = x.shape[-1]
    # Segment-id equality mask built from f32 iota; +0.5 keeps floor() robust
    # to division rounding (margin 0.5/c is far above any f32 div error).
    ir = jax.lax.broadcasted_iota(jnp.int32, (w, w), 0).astype(jnp.float32)
    ic = jax.lax.broadcasted_iota(jnp.int32, (w, w), 1).astype(jnp.float32)
    cf = jnp.float32(c)
    m = (jnp.floor((ir + 0.5) / cf) == jnp.floor((ic + 0.5) / cf))
    m = m.astype(jnp.float32)
    sumsq = jnp.dot(x * x, m, preferred_element_type=jnp.float32,
                    precision=jax.lax.Precision.HIGHEST)
    inv = jax.lax.rsqrt(jnp.maximum(sumsq, _EPS * _EPS))
    o_ref[...] = (x * inv).astype(o_ref.dtype)


def _sumsq_mid_kernel(x_ref, inv_ref, *, tc, c_total):
    # Pass 1 of the reduction-tiled mid path: accumulate sumsq over C blocks,
    # masking the padded channel tail, and finalize to rsqrt on the last step.
    kc = pl.program_id(2)

    @pl.when(kc == 0)
    def _init():
        inv_ref[...] = jnp.zeros_like(inv_ref)

    x = x_ref[...].astype(jnp.float32)
    ch = jax.lax.broadcasted_iota(jnp.int32, x.shape, 1) + kc * tc
    x = jnp.where(ch < c_total, x, 0.0)
    inv_ref[...] += jnp.sum(x * x, axis=1, keepdims=True)

    @pl.when(kc == pl.num_programs(2) - 1)
    def _finalize():
        inv_ref[...] = jax.lax.rsqrt(jnp.maximum(inv_ref[...], _EPS * _EPS))


def _scale_mid_kernel(x_ref, inv_ref, o_ref):
    o_ref[...] = (x_ref[...].astype(jnp.float32) * inv_ref[...]).astype(o_ref.dtype)


def _sumsq_last_kernel(x_ref, inv_ref, *, td, d_total):
    # Pass 1 of the reduction-tiled trailing-dim path.
    kd = pl.program_id(1)

    @pl.when(kd == 0)
    def _init():
        inv_ref[...] = jnp.zeros_like(inv_ref)

    x = x_ref[...].astype(jnp.float32)
    col = jax.lax.broadcasted_iota(jnp.int32, x.shape, 1) + kd * td
    x = jnp.where(col < d_total, x, 0.0)
    inv_ref[...] += jnp.sum(x * x, axis=-1, keepdims=True)

    @pl.when(kd == pl.num_programs(1) - 1)
    def _finalize():
        inv_ref[...] = jax.lax.rsqrt(jnp.maximum(inv_ref[...], _EPS * _EPS))


def _scale_last_kernel(x_ref, inv_ref, o_ref):
    o_ref[...] = (x_ref[...].astype(jnp.float32) * inv_ref[...]).astype(o_ref.dtype)


# --------------------------------------------------------------------------
# Wrappers
# --------------------------------------------------------------------------

def _normalize_mid_tiled_c(x3, tb, tc, tp, vmem_limit):
    """Two-pass path for C too large for a single block: tile the reduction
    axis with an 'arbitrary' grid axis (pass 1: inv = rsqrt(sumsq); pass 2:
    scale)."""
    pre, c, post = (int(s) for s in x3.shape)
    dtype = x3.dtype
    grid = (pl.cdiv(pre, tb), pl.cdiv(post, tp), pl.cdiv(c, tc))

    x_spec = pl.BlockSpec((tb, tc, tp), lambda i, j, k: (i, k, j))
    inv_spec = pl.BlockSpec((tb, 1, tp), lambda i, j, k: (i, 0, j))

    inv = pl.pallas_call(
        functools.partial(_sumsq_mid_kernel, tc=tc, c_total=c),
        out_shape=jax.ShapeDtypeStruct((pre, 1, post), jnp.float32),
        grid=grid,
        in_specs=[x_spec],
        out_specs=inv_spec,
        compiler_params=_compiler_params(
            ("parallel", "parallel", "arbitrary"), vmem_limit),
    )(x3)

    return pl.pallas_call(
        _scale_mid_kernel,
        out_shape=jax.ShapeDtypeStruct(x3.shape, dtype),
        grid=grid,
        in_specs=[x_spec, inv_spec],
        out_specs=x_spec,
        compiler_params=_compiler_params(
            ("parallel", "parallel", "parallel"), vmem_limit),
    )(x3, inv)


def _normalize_last_tiled_d(x2, tm, td, vmem_limit):
    """Two-pass path for D too large for a single block (trailing dim)."""
    rows, d = (int(s) for s in x2.shape)
    dtype = x2.dtype
    if rows <= tm:
        tm = rows
    grid = (pl.cdiv(rows, tm), pl.cdiv(d, td))

    x_spec = pl.BlockSpec((tm, td), lambda i, k: (i, k))
    inv_spec = pl.BlockSpec((tm, 1), lambda i, k: (i, 0))

    inv = pl.pallas_call(
        functools.partial(_sumsq_last_kernel, td=td, d_total=d),
        out_shape=jax.ShapeDtypeStruct((rows, 1), jnp.float32),
        grid=grid,
        in_specs=[x_spec],
        out_specs=inv_spec,
        compiler_params=_compiler_params(("parallel", "arbitrary"), vmem_limit),
    )(x2)

    return pl.pallas_call(
        _scale_last_kernel,
        out_shape=jax.ShapeDtypeStruct(x2.shape, dtype),
        grid=grid,
        in_specs=[x_spec, inv_spec],
        out_specs=x_spec,
        compiler_params=_compiler_params(("parallel", "parallel"), vmem_limit),
    )(x2, inv)


def _normalize_mid(x3, cost, vmem_limit):
    """x3: (pre, C, post); normalize over the middle axis."""
    pre, c, post = (int(s) for s in x3.shape)
    dtype = x3.dtype
    sub = _sublane_multiple(dtype)
    cpad = _round_up(c, sub)                 # physical sublane padding
    post_pad = _round_up(post, 128)          # physical lane padding
    max_elems = _max_block_elems(dtype, vmem_limit)

    if cpad * 128 > max_elems:
        # Even a (1, C, 128) block blows the VMEM budget: tile the reduction.
        tp = post if post <= 512 else 512
        tp_phys = _round_up(tp, 128)
        tc = max(sub, (max_elems // tp_phys) // sub * sub)
        return _normalize_mid_tiled_c(x3, 1, tc, tp, vmem_limit)

    # Grow the lane-contiguous post tile first, then the leading pre tile.
    if cpad * post_pad <= max_elems:
        tp, tp_phys = post, post_pad
    else:
        tp = max(128, (max_elems // cpad) // 128 * 128)
        tp_phys = tp
    tb = min(pre, max(1, max_elems // (cpad * tp_phys)))

    n_pre, n_post = pl.cdiv(pre, tb), pl.cdiv(post, tp)
    if n_pre * n_post == 1 and pre * cpad * post_pad > _MIN_SPLIT_ELEMS:
        # Single-block grid on a potentially dual-TensorCore chip (v7x):
        # guarantee >= 2 parallel blocks when the input is big enough.
        if pre >= 2:
            tb = pl.cdiv(pre, 2)
        elif post >= 256:
            tp = _round_up(pl.cdiv(post, 2), 128)
        n_pre, n_post = pl.cdiv(pre, tb), pl.cdiv(post, tp)

    return pl.pallas_call(
        _l2norm_mid_kernel,
        out_shape=jax.ShapeDtypeStruct(x3.shape, dtype),
        grid=(n_pre, n_post),
        in_specs=[pl.BlockSpec((tb, c, tp), lambda i, j: (i, 0, j))],
        out_specs=pl.BlockSpec((tb, c, tp), lambda i, j: (i, 0, j)),
        compiler_params=_compiler_params(("parallel", "parallel"), vmem_limit),
        cost_estimate=cost,
    )(x3)


def _normalize_last(x2, cost, vmem_limit):
    """x2: (rows, D); normalize over the last axis (D kept at full extent)."""
    rows, d = (int(s) for s in x2.shape)
    dtype = x2.dtype
    sub = _sublane_multiple(dtype)
    dpad = _round_up(d, 128)
    max_elems = _max_block_elems(dtype, vmem_limit)

    if sub * dpad > max_elems:
        # D alone exceeds the VMEM budget: tile the reduction axis.
        td = max(128, (max_elems // sub) // 128 * 128)
        return _normalize_last_tiled_d(x2, sub, td, vmem_limit)

    tm = max(sub, (max_elems // dpad) // sub * sub)
    if rows <= tm:
        tm = rows
    n_rows = pl.cdiv(rows, tm)
    if n_rows == 1 and rows >= 2 * sub and rows * dpad > _MIN_SPLIT_ELEMS:
        tm = _round_up(pl.cdiv(rows, 2), sub)     # >=2 blocks for dual-TC v7x
        n_rows = pl.cdiv(rows, tm)

    return pl.pallas_call(
        _l2norm_last_kernel,
        out_shape=jax.ShapeDtypeStruct(x2.shape, dtype),
        grid=(n_rows,),
        in_specs=[pl.BlockSpec((tm, d), lambda i: (i, 0))],
        out_specs=pl.BlockSpec((tm, d), lambda i: (i, 0)),
        compiler_params=_compiler_params(("parallel",), vmem_limit),
        cost_estimate=cost,
    )(x2)


def _pack_factor(rows: int, c: int) -> int:
    """Largest k dividing `rows` with k*c <= ~128 (lane-dense packing)."""
    if c >= 128 or rows <= 1:
        return 1
    max_pack = min(rows, max(1, _PACK_LANE_TARGET // c))
    for k in range(max_pack, 1, -1):
        if rows % k == 0:
            return k
    return 1


def _normalize_last_packed(x2, k, cost, vmem_limit):
    """Small-C trailing-dim path: pack k vectors per lane row (free reshape)
    so loads/stores are lane-dense instead of masked C-of-128-lane vst's."""
    rows, c = (int(s) for s in x2.shape)
    dtype = x2.dtype
    sub = _sublane_multiple(dtype)
    w = k * c
    prow = rows // k
    xp = x2.reshape(prow, w)                 # row-major: free, no data movement
    wpad = _round_up(w, 128)
    max_elems = _max_block_elems(dtype, vmem_limit)

    tm = max(sub, (max_elems // wpad) // sub * sub)
    if prow <= tm:
        tm = prow
    n_rows = pl.cdiv(prow, tm)
    if n_rows == 1 and prow >= 2 * sub and prow * wpad > _MIN_SPLIT_ELEMS:
        tm = _round_up(pl.cdiv(prow, 2), sub)
        n_rows = pl.cdiv(prow, tm)

    out = pl.pallas_call(
        functools.partial(_l2norm_packed_kernel, c=c),
        out_shape=jax.ShapeDtypeStruct((prow, w), dtype),
        grid=(n_rows,),
        in_specs=[pl.BlockSpec((tm, w), lambda i: (i, 0))],
        out_specs=pl.BlockSpec((tm, w), lambda i: (i, 0)),
        compiler_params=_compiler_params(("parallel",), vmem_limit),
        cost_estimate=cost,
    )(xp)
    return out.reshape(rows, c)


def pallas_l2_normalize(x: jax.Array, dim: int) -> jax.Array:
    """Equivalent of torch.nn.functional.normalize(x, dim=dim, p=2)."""
    dim = dim % x.ndim
    shape = x.shape
    if x.size == 0:
        return x
    pre = int(np.prod(shape[:dim], dtype=np.int64)) if dim > 0 else 1
    c = int(shape[dim])
    post = (int(np.prod(shape[dim + 1:], dtype=np.int64))
            if dim < x.ndim - 1 else 1)

    n = pre * c * post
    itemsize = jnp.dtype(x.dtype).itemsize
    cost = pl.CostEstimate(
        flops=3 * n,                       # square + accumulate + scale
        transcendentals=pre * post,        # one rsqrt per normalized vector
        bytes_accessed=2 * n * itemsize,   # read x, write out
    )
    vmem_limit = _vmem_limit_bytes()

    if post == 1:
        x2 = x.reshape(pre, c)
        k = _pack_factor(pre, c)
        if k > 1:
            out = _normalize_last_packed(x2, k, cost, vmem_limit)
        else:
            # TODO(synk): rows with no usable divisor (e.g. prime row counts
            # with tiny C) fall back to the masked-store path; could pack the
            # bulk and handle the remainder separately if it ever matters.
            out = _normalize_last(x2, cost, vmem_limit)
    else:
        out = _normalize_mid(x.reshape(pre, c, post), cost, vmem_limit)
    return out.reshape(shape)


class Normalize:
    """JAX/Pallas port of the PyTorch Normalize module (F.normalize, p=2)."""

    def __init__(self, dim: int) -> None:
        self.dim = dim

    def __call__(self, x: jax.Array) -> jax.Array:
        return pallas_l2_normalize(x, self.dim)


if __name__ == "__main__":
    def ref_l2(x, dim):
        ss = jnp.sum(jnp.square(x.astype(jnp.float32)), axis=dim, keepdims=True)
        return (x.astype(jnp.float32)
                / jnp.maximum(jnp.sqrt(ss), _EPS)).astype(x.dtype)

    key = jax.random.PRNGKey(0)
    k1, k2, k3, k4 = jax.random.split(key, 4)

    # 1) Module usage: NCHW features, normalize over channels (dim=1).
    x = jax.random.normal(k1, (2, 4, 16, 16), dtype=jnp.float32)
    out = jax.block_until_ready(Normalize(dim=1)(x))
    np.testing.assert_allclose(np.asarray(out), np.asarray(ref_l2(x, 1)),
                               rtol=1e-5, atol=1e-5)

    # 2) Trailing-dim, small-C path (lane-packed, MXU segmented reduce).
    x2 = jax.random.normal(k2, (2, 8, 32), dtype=jnp.float32)
    out2 = jax.block_until_ready(Normalize(dim=-1)(x2))
    np.testing.assert_allclose(np.asarray(out2), np.asarray(ref_l2(x2, -1)),
                               rtol=1e-4, atol=1e-4)

    # 3) Reduction-tiled (large-C) mid path, forced small tiles to exercise
    #    the masked edge block and the two-pass accumulator.
    x3 = jax.random.normal(k3, (2, 20, 256), dtype=jnp.float32)
    out3 = jax.block_until_ready(
        _normalize_mid_tiled_c(x3, tb=1, tc=8, tp=128,
                               vmem_limit=_vmem_limit_bytes()))
    np.testing.assert_allclose(np.asarray(out3), np.asarray(ref_l2(x3, 1)),
                               rtol=1e-5, atol=1e-5)

    # 4) Reduction-tiled (large-D) trailing-dim path.
    x4 = jax.random.normal(k4, (16, 300), dtype=jnp.float32)
    out4 = jax.block_until_ready(
        _normalize_last_tiled_d(x4, tm=8, td=128,
                                vmem_limit=_vmem_limit_bytes()))
    np.testing.assert_allclose(np.asarray(out4), np.asarray(ref_l2(x4, -1)),
                               rtol=1e-5, atol=1e-5)

    print("KERNEL_OK")
</pallas_src>

<mosaic_0001>
module attributes {stable_mosaic.version = 11 : i64} {
  func.func @_l2norm_mid_kernel(%arg0: i32, %arg1: i32, %arg2: memref<2x4x256xf32, #tpu.memory_space<vmem>>, %arg3: memref<2x4x256xf32, #tpu.memory_space<vmem>>) attributes {dimension_semantics = [#tpu.dimension_semantics<parallel>, #tpu.dimension_semantics<parallel>], iteration_bounds = array<i64: 1, 1>, scalar_prefetch = 0 : i64, scratch_operands = 0 : i64, tpu.core_type = #tpu.core_type<tc>, window_params = [{transform_indices = @transform_0, window_bounds = array<i64: 2, 4, 256>}, {transform_indices = @transform_1, window_bounds = array<i64: 2, 4, 256>}]} {
    %c0 = arith.constant 0 : index
    %c0_0 = arith.constant 0 : index
    %c0_1 = arith.constant 0 : index
    %0 = vector.load %arg2[%c0, %c0_0, %c0_1] : memref<2x4x256xf32, #tpu.memory_space<vmem>>, vector<2x4x256xf32>
    %1 = arith.mulf %0, %0 : vector<2x4x256xf32>
    %cst = arith.constant dense<0.000000e+00> : vector<2x256xf32>
    %2 = vector.multi_reduction <add>, %1, %cst [1] : vector<2x4x256xf32> to vector<2x256xf32>
    %3 = vector.shape_cast %2 : vector<2x256xf32> to vector<2x1x256xf32>
    %cst_2 = arith.constant 1.000000e-24 : f32
    %4 = vector.broadcast %cst_2 : f32 to vector<2x1x256xf32>
    %5 = arith.maximumf %3, %4 : vector<2x1x256xf32>
    %6 = math.rsqrt %5 : vector<2x1x256xf32>
    %7 = vector.broadcast %6 : vector<2x1x256xf32> to vector<2x4x256xf32>
    %8 = arith.mulf %0, %7 : vector<2x4x256xf32>
    %c0_3 = arith.constant 0 : index
    %c0_4 = arith.constant 0 : index
    %c0_5 = arith.constant 0 : index
    %9 = vector.load %arg3[%c0_3, %c0_4, %c0_5] : memref<2x4x256xf32, #tpu.memory_space<vmem>>, vector<2x4x256xf32>
    tpu.vector_store %arg3[%c0_3, %c0_4, %c0_5], %8 {strides = array<i32>} : memref<2x4x256xf32, #tpu.memory_space<vmem>>, vector<2x4x256xf32>,
    return
  }
  func.func @transform_0(%arg0: i32, %arg1: i32) -> (i32, i32, i32) {
    %c0_i32 = arith.constant 0 : i32
    %c0_i32_0 = arith.constant 0 : i32
    return %arg0, %c0_i32, %arg1 : i32, i32, i32
  }
  func.func @transform_1(%arg0: i32, %arg1: i32) -> (i32, i32, i32) {
    %c0_i32 = arith.constant 0 : i32
    %c0_i32_0 = arith.constant 0 : i32
    return %arg0, %c0_i32, %arg1 : i32, i32, i32
  }
}

</mosaic_0001>

<bundles_post_ra>
// kernel: tpu_custom_call.1
= control target key start
LH: loop header
LB: loop body
LE: loop exit
PB: predicated region body
PF: predicated region fallthrough
CT: control target
= control target key end

     0   :  { %6 = vsyncpa [#allocation3], 0  ;;  %s203_s0 = inlined_call_operand.hbm [shape: f32[2,4,256], index: 0, kind: input, shape index: {}]   ;;  %s204_s1 = inlined_call_operand.hbm [shape: f32[2,4,256], index: 1, kind: output, shape index: {}]  }
   0x1   :  { %7 = vsyncpa [#allocation4], 0  ;;  %s159_s6 = smov [#allocation2]   ;;  %s111_s10 = scalar_lea.hbm %s203_s0, 256 }
   0x2   :  { %s13_s7 = sshll.u32 %s159_s6, 4  ;;  %p112_p0 = scmp.ne.s32.totalorder %s203_s0, %s111_s10  ;;  %s14_s7 = int_to_ptr.vmem [resolvable:$true] %s13_s7 }
   0x3   :  { %p115_p1 = scmp.lt.u32.totalorder %s111_s10, %s203_s0 }
   0x5   :  { %p117_p2 = pnand %p115_p1, %p112_p0 }
   0x7   :  { %120 = shalt.err (!%p117_p2)
}
   0x8   :  { %s121_s15 = scalar_lea.vmem %s14_s7, 256  ;;  %p126_p4 = scmp.lt.s32.totalorder %s14_s7, %s14_s7 }
   0x9   :  { %p122_p3 = scmp.ne.s32.totalorder %s14_s7, %s121_s15  ;;  %p127_p5 = scmp.lt.s32.totalorder %s121_s15, %s121_s15 }
   0xb   :  { %p128_p6 = por %p127_p5, %p126_p4 }
   0xd   :  { %p129_p7 = pnand %p128_p6, %p122_p3 }
   0xf   :  { %132 = shalt.err (!%p129_p7)
}
  0x10   :  { %s160_s16 = smov 128   ;;  %s161_s17 = smov 8  }
  0x11   :  { %19 = dma.hbm_to_vmem [thread:$0]  %s203_s0, 256, %s14_s7, [#allocation3], %s160_s16, %s160_s16, %s161_s17  }
  0x12   :  { %155 = dma.done.wait [#allocation3], 256  }
  0x13   :  { %156 = vsyncadd [#allocation3], 4294967040  ;;  %v23_v0 = vld [vmem:[#allocation2] sm:$0xff]  ;;  %vm33_vm0 = vcmask 1043456   ;;  %v24_v1 = vld [vmem:[#allocation2 + $0x8] sm:$0xff]  ;;  %s162_s0 = smov [#allocation5]  }
  0x14   :  { %v25_v2 = vmul.f32 %v23_v0, %v23_v0  ;;  %v26_v3 = vmul.f32 %v24_v1, %v24_v1  ;;  %s87_s20 = sshll.u32 %s162_s0, 4  ;;  %s88_s20 = int_to_ptr.vmem [resolvable:$true] %s87_s20 }
  0x15   :  { %s133_s21 = scalar_lea.vmem %s88_s20, 256  ;;  %p138_p9 = scmp.lt.s32.totalorder %s88_s20, %s88_s20 }
  0x16   :  { %v29_v4 = vcombine.high %v25_v2, %v25_v2  ;;  %v34_v5 = vsel %vm33_vm0, %v25_v2, 0.0  ;;  %v30_v6 = vcombine.high %v26_v3, %v26_v3  ;;  %v48_v7 = vsel %vm33_vm0, %v26_v3, 0.0  ;;  %p134_p8 = scmp.ne.s32.totalorder %s88_s20, %s133_s21  ;;  %p139_p10 = scmp.lt.s32.totalorder %s133_s21, %s133_s21 }
  0x17   :  { %v35_v8 = vrot.slane %v34_v5, 4  ;;  %v49_v9 = vrot.slane %v48_v7, 4 }
  0x18   :  { %v41_v10 = vsel %vm33_vm0, %v29_v4, 0.0  ;;  %v55_v11 = vsel %vm33_vm0, %v30_v6, 0.0  ;;  %p140_p11 = por %p139_p10, %p138_p9 }
  0x19   :  { %v36_v12 = vadd.f32 %v35_v8, %v34_v5  ;;  %v42_v13 = vrot.slane %v41_v10, 4  ;;  %v50_v14 = vadd.f32 %v49_v9, %v48_v7  ;;  %v56_v15 = vrot.slane %v55_v11, 4 }
  0x1a   :  { %p141_p12 = pnand %p140_p11, %p134_p8 }
  0x1b   :  { %v37_v16 = vrot.slane %v36_v12, 2  ;;  %v43_v17 = vadd.f32 %v42_v13, %v41_v10  ;;  %v51_v18 = vrot.slane %v50_v14, 2  ;;  %v57_v19 = vadd.f32 %v56_v15, %v55_v11 }
  0x1d   :  { %v38_v20 = vadd.f32 %v37_v16, %v36_v12  ;;  %v44_v21 = vrot.slane %v43_v17, 2  ;;  %v52_v22 = vadd.f32 %v51_v18, %v50_v14  ;;  %v58_v23 = vrot.slane %v57_v19, 2 }
  0x1f   :  { %v39_v24 = vrot.slane %v38_v20, 1  ;;  %v45_v25 = vadd.f32 %v44_v21, %v43_v17  ;;  %v53_v26 = vrot.slane %v52_v22, 1  ;;  %v59_v27 = vadd.f32 %v58_v23, %v57_v19 }
  0x21   :  { %v40_v28 = vadd.f32 %v39_v24, %v38_v20  ;;  %v46_v29 = vrot.slane %v45_v25, 1  ;;  %v54_v30 = vadd.f32 %v53_v26, %v52_v22  ;;  %v60_v31 = vrot.slane %v59_v27, 1 }
  0x23   :  { %v47_v32 = vadd.f32 %v46_v29, %v45_v25  ;;  %v62_v33 = vmax.f32 %v40_v28, 1e-24  ;;  %v61_v34 = vadd.f32 %v60_v31, %v59_v27  ;;  %v64_v35 = vmax.f32 %v54_v30, 1e-24 }
  0x25   :  { %v63_v36 = vmax.f32 %v47_v32, 1e-24  ;;  %103 = vrsqrt.f32 %v62_v33  ;;  %v65_v37 = vmax.f32 %v61_v34, 1e-24 }
  0x26   :  { %105 = vrsqrt.f32 %v64_v35 }
  0x27   :  { %107 = vrsqrt.f32 %v63_v36 }
  0x28   :  { %109 = vrsqrt.f32 %v65_v37 }
  0x2f   :  { %v104_v38 = vpop.eup %103 }
  0x30   :  { %v106_v39 = vpop.eup %105 }
  0x31   :  { %v108_v40 = vpop.eup %107 }
  0x32   :  { %v110_v41 = vpop.eup %109  ;;  %v74_v42 = vcombine.low %v104_v38, %v108_v40 }
  0x33   :  { %v75_v43 = vcombine.low %v106_v39, %v110_v41 }
  0x34   :  { %v78_v44 = vmul.f32 %v74_v42, %v23_v0 }
  0x35   :  { %v79_v45 = vmul.f32 %v75_v43, %v24_v1 }
  0x36   :  { %80 = vst [vmem:[#allocation5] sm:$0xff] %v78_v44 }
  0x37   :  { %81 = vst [vmem:[#allocation5 + $0x8] sm:$0xff] %v79_v45 }
  0x38   :  { %144 = shalt.err (!%p141_p12)
}
  0x39   :  { %s145_s24 = scalar_lea.hbm %s204_s1, 256 }
  0x3a   :  { %p146_p13 = scmp.ne.s32.totalorder %s204_s1, %s145_s24  ;;  %p149_p0 = scmp.lt.u32.totalorder %s145_s24, %s204_s1 }
  0x3c   :  { %p151_p1 = pnand %p149_p0, %p146_p13 }
  0x3e   :  { %154 = shalt.err (!%p151_p1)
}
  0x3f   :  { %93 = dma.vmem_to_hbm [thread:$0]  %s88_s20, 256, %s204_s1, [#allocation4], %s160_s16, %s160_s16, %s161_s17  }
  0x40   :  { %157 = dma.done.wait [#allocation4], 256  }
  0x41   :  { %158 = vsyncadd [#allocation4], 4294967040 }
  0x42   :  { %97 = vsyncpa [#allocation3], 1 }
  0x43   :  { %98 = vsyncpa [#allocation4], 1 }

</bundles_post_ra>
